<compile_context>
chip_gen: v7x
topology: tpu7x:2x2x1
jax: 0.10.0
libtpu: 0.0.40
codegen_flags: <defaults>
</compile_context>

<pallas_src>
import jax
import jax.numpy as jnp
from jax.experimental import pallas as pl
from jax.experimental.pallas import tpu as pltpu


def _error_unit_kernel(state_ref, recon_ref, wt_ref, b_ref, td_ref, bu_ref):
    """Fused ErrorUnit forward for one row tile.

    state_ref: (TB, Dt)  state_ rows (one row == one forward() call)
    recon_ref: (TB, Dt)  recon_ rows
    wt_ref:    (Dt, Dh)  W.weight pre-transposed (f32 or bf16), VMEM-resident
    b_ref:     (1, Dh)   W.bias (f32), VMEM-resident
    td_ref:    (TB, Dt)  TD_err output (input dtype)
    bu_ref:    (TB, Dh)  BU_err output (f32)
    """
    # TD_err = state_ - recon_   (kept in the input dtype, as in PyTorch)
    td = state_ref[...] - recon_ref[...]
    td_ref[...] = td.astype(td_ref.dtype)

    # BU_err = TD_err.float() @ W^T + b   -- single MXU push per tile, f32 accumulation.
    # Cast the LHS to the weight dtype (f32 to mirror .float(); bf16 on the fast path).
    lhs = td.astype(wt_ref.dtype)
    bu = jnp.dot(lhs, wt_ref[...], preferred_element_type=jnp.float32) + b_ref[...]
    bu_ref[...] = bu.astype(bu_ref.dtype)


def prepare_error_unit_params(weight, bias, *, use_bf16_matmul=False):
    """One-time parameter preparation (kept OUT of any per-step loop).

    weight: (higherlayer_dim, thislayer_dim) -- PyTorch nn.Linear layout
    bias:   (higherlayer_dim,)
    use_bf16_matmul: store W^T (and feed the LHS) as bf16 for the MXU-native path.
                     Relaxes the match vs the f32 PyTorch reference to ~1e-2 rel.
    """
    w_dtype = jnp.bfloat16 if use_bf16_matmul else jnp.float32
    return {
        "W_t": jnp.asarray(weight, jnp.float32).T.astype(w_dtype),   # (Dt, Dh)
        "b": jnp.asarray(bias, jnp.float32)[None, :],                # (1, Dh)
    }


def error_unit_forward(state_, recon_, params, *, block_rows=512):
    """Runs ErrorUnit.forward for every row of state_/recon_ in ONE kernel launch.

    state_, recon_: (Dt,) for a single forward() call, or (B, Dt) for B fused calls.
    Returns (TD_err, BU_err): (B, Dt) in the input dtype and (B, Dh) float32.

    NOTE: single-row (B=1) calls are supported but pay the full launch cost; callers
    in hot loops should accumulate timesteps/samples and batch them (B >= 128).
    """
    squeeze = state_.ndim == 1
    s = state_[None, :] if squeeze else state_
    r = recon_[None, :] if squeeze else recon_

    B, Dt = s.shape
    W_t = params["W_t"]
    b = params["b"]
    Dh = b.shape[-1]
    in_dtype = s.dtype

    # Row tile: multiple of 8 sublanes, capped so double-buffered tiles stay tiny
    # (well under v7x's 64 MiB VMEM, let alone v5e/v6e's 128 MiB).
    TB = min(int(block_rows), ((B + 7) // 8) * 8)
    TB = max(8, (TB // 8) * 8)
    Bp = ((B + TB - 1) // TB) * TB
    if Bp != B:
        s = jnp.pad(s, ((0, Bp - B), (0, 0)))
        r = jnp.pad(r, ((0, Bp - B), (0, 0)))
    grid = (Bp // TB,)

    cost = pl.CostEstimate(
        flops=2 * Bp * Dt * Dh + Bp * (Dt + Dh),
        transcendentals=0,
        bytes_accessed=(s.dtype.itemsize * 2 * Bp * Dt        # state_, recon_ in
                        + W_t.dtype.itemsize * Dt * Dh + 4 * Dh  # weights, bias
                        + in_dtype.itemsize * Bp * Dt            # TD_err out
                        + 4 * Bp * Dh),                          # BU_err out
    )

    td_pad, bu_pad = pl.pallas_call(
        _error_unit_kernel,
        out_shape=(
            jax.ShapeDtypeStruct((Bp, Dt), in_dtype),
            jax.ShapeDtypeStruct((Bp, Dh), jnp.float32),
        ),
        grid=grid,
        in_specs=[
            pl.BlockSpec((TB, Dt), lambda i: (i, 0)),   # state_: streamed row tiles
            pl.BlockSpec((TB, Dt), lambda i: (i, 0)),   # recon_: streamed row tiles
            pl.BlockSpec((Dt, Dh), lambda i: (0, 0)),   # W^T: VMEM-resident across grid
            pl.BlockSpec((1, Dh), lambda i: (0, 0)),    # bias: VMEM-resident across grid
        ],
        out_specs=(
            pl.BlockSpec((TB, Dt), lambda i: (i, 0)),   # TD_err
            pl.BlockSpec((TB, Dh), lambda i: (i, 0)),   # BU_err
        ),
        compiler_params=pltpu.CompilerParams(
            dimension_semantics=("parallel",),           # shards rows across v7x's 2 TCs
        ),
        cost_estimate=cost,
    )(s, r, W_t, b)

    td_err = td_pad[:B]
    bu_err = bu_pad[:B]
    if squeeze:
        td_err, bu_err = td_err[0], bu_err[0]
    return td_err, bu_err
    # TODO(synk): for maximum benefit, fuse this with the recon producer and/or the
    # higher-layer consumer of BU_err in the same pallas_call instead of a standalone op.


def _reference_forward(state_, recon_, weight, bias):
    """Plain-JAX reference of the PyTorch semantics (row-wise)."""
    td = state_ - recon_
    bu = td.astype(jnp.float32) @ weight.T + bias
    return td, bu


if __name__ == "__main__":
    # Module-consistent small dims; enough rows that the row-tiled grid has >1 step.
    thislayer_dim = 32
    higherlayer_dim = 64
    B = 256            # 256 fused ErrorUnit.forward() applications
    TB = 128           # row tile -> grid=(2,)

    key = jax.random.PRNGKey(0)
    k_w, k_b, k_s, k_r = jax.random.split(key, 4)

    # nn.Linear(thislayer_dim, higherlayer_dim): weight (Dh, Dt), bias (Dh,)
    W = 0.1 * jax.random.normal(k_w, (higherlayer_dim, thislayer_dim), jnp.float32)
    bias = 0.1 * jax.random.normal(k_b, (higherlayer_dim,), jnp.float32)

    # Pre-transpose / pre-reshape the parameters exactly once (f32 path: bit-match).
    params = prepare_error_unit_params(W, bias, use_bf16_matmul=False)

    state_ = jax.random.normal(k_s, (B, thislayer_dim), jnp.float32)
    recon_ = jax.random.normal(k_r, (B, thislayer_dim), jnp.float32)

    td_err, bu_err = error_unit_forward(state_, recon_, params, block_rows=TB)
    jax.block_until_ready((td_err, bu_err))

    # Verify against the pure-JAX reference.
    r_td, r_bu = _reference_forward(state_, recon_, W, bias)
    assert td_err.shape == (B, thislayer_dim) and td_err.dtype == state_.dtype
    assert bu_err.shape == (B, higherlayer_dim) and bu_err.dtype == jnp.float32
    assert jnp.allclose(td_err, r_td, atol=1e-5)
    assert jnp.allclose(bu_err, r_bu, atol=1e-5)

    # Single-call (1-D) path still works, matching a lone ErrorUnit.forward().
    td1, bu1 = error_unit_forward(state_[0], recon_[0], params)
    jax.block_until_ready((td1, bu1))
    assert td1.shape == (thislayer_dim,) and bu1.shape == (higherlayer_dim,)
    assert jnp.allclose(td1, r_td[0], atol=1e-5)
    assert jnp.allclose(bu1, r_bu[0], atol=1e-5)

    print("KERNEL_OK")
</pallas_src>

<mosaic_0001>
module attributes {stable_mosaic.version = 11 : i64} {
  func.func @_error_unit_kernel(%arg0: i32, %arg1: memref<128x32xf32, #tpu.memory_space<vmem>>, %arg2: memref<128x32xf32, #tpu.memory_space<vmem>>, %arg3: memref<32x64xf32, #tpu.memory_space<vmem>>, %arg4: memref<1x64xf32, #tpu.memory_space<vmem>>, %arg5: memref<128x32xf32, #tpu.memory_space<vmem>>, %arg6: memref<128x64xf32, #tpu.memory_space<vmem>>) attributes {dimension_semantics = [#tpu.dimension_semantics<parallel>], iteration_bounds = array<i64: 2>, scalar_prefetch = 0 : i64, scratch_operands = 0 : i64, tpu.core_type = #tpu.core_type<tc>, window_params = [{transform_indices = @transform_0, window_bounds = array<i64: 128, 32>}, {transform_indices = @transform_1, window_bounds = array<i64: 128, 32>}, {pipeline_mode = #tpu.pipeline_mode<synchronous>, transform_indices = @transform_2, window_bounds = array<i64: 32, 64>}, {pipeline_mode = #tpu.pipeline_mode<synchronous>, transform_indices = @transform_3, window_bounds = array<i64: 1, 64>}, {transform_indices = @transform_4, window_bounds = array<i64: 128, 32>}, {transform_indices = @transform_5, window_bounds = array<i64: 128, 64>}]} {
    %c0 = arith.constant 0 : index
    %c0_0 = arith.constant 0 : index
    %0 = vector.load %arg1[%c0, %c0_0] : memref<128x32xf32, #tpu.memory_space<vmem>>, vector<128x32xf32>
    %c0_1 = arith.constant 0 : index
    %c0_2 = arith.constant 0 : index
    %1 = vector.load %arg2[%c0_1, %c0_2] : memref<128x32xf32, #tpu.memory_space<vmem>>, vector<128x32xf32>
    %2 = arith.subf %0, %1 : vector<128x32xf32>
    %c0_3 = arith.constant 0 : index
    %c0_4 = arith.constant 0 : index
    %3 = vector.load %arg5[%c0_3, %c0_4] : memref<128x32xf32, #tpu.memory_space<vmem>>, vector<128x32xf32>
    tpu.vector_store %arg5[%c0_3, %c0_4], %2 {strides = array<i32>} : memref<128x32xf32, #tpu.memory_space<vmem>>, vector<128x32xf32>,
    %c0_5 = arith.constant 0 : index
    %c0_6 = arith.constant 0 : index
    %4 = vector.load %arg3[%c0_5, %c0_6] : memref<32x64xf32, #tpu.memory_space<vmem>>, vector<32x64xf32>
    %cst = arith.constant dense<0.000000e+00> : vector<128x64xf32>
    %5 = tpu.matmul %2, %4, %cst {dimension_numbers = #tpu.dot_dimension_numbers<[1], [0], [0], [1], [0, 0, 1, 1], [], []>} : vector<128x32xf32>, vector<32x64xf32>, vector<128x64xf32> -> vector<128x64xf32>
    %c0_7 = arith.constant 0 : index
    %c0_8 = arith.constant 0 : index
    %6 = vector.load %arg4[%c0_7, %c0_8] : memref<1x64xf32, #tpu.memory_space<vmem>>, vector<1x64xf32>
    %7 = vector.broadcast %6 : vector<1x64xf32> to vector<128x64xf32>
    %8 = arith.addf %5, %7 : vector<128x64xf32>
    %c0_9 = arith.constant 0 : index
    %c0_10 = arith.constant 0 : index
    %9 = vector.load %arg6[%c0_9, %c0_10] : memref<128x64xf32, #tpu.memory_space<vmem>>, vector<128x64xf32>
    tpu.vector_store %arg6[%c0_9, %c0_10], %8 {strides = array<i32>} : memref<128x64xf32, #tpu.memory_space<vmem>>, vector<128x64xf32>,
    return
  }
  func.func @transform_0(%arg0: i32) -> (i32, i32) {
    %c0_i32 = arith.constant 0 : i32
    %c0_i32_0 = arith.constant 0 : i32
    return %arg0, %c0_i32 : i32, i32
  }
  func.func @transform_1(%arg0: i32) -> (i32, i32) {
    %c0_i32 = arith.constant 0 : i32
    %c0_i32_0 = arith.constant 0 : i32
    return %arg0, %c0_i32 : i32, i32
  }
  func.func @transform_2(%arg0: i32) -> (i32, i32) {
    %c0_i32 = arith.constant 0 : i32
    %c0_i32_0 = arith.constant 0 : i32
    %c0_i32_1 = arith.constant 0 : i32
    return %c0_i32, %c0_i32_0 : i32, i32
  }
  func.func @transform_3(%arg0: i32) -> (i32, i32) {
    %c0_i32 = arith.constant 0 : i32
    %c0_i32_0 = arith.constant 0 : i32
    %c0_i32_1 = arith.constant 0 : i32
    return %c0_i32, %c0_i32_0 : i32, i32
  }
  func.func @transform_4(%arg0: i32) -> (i32, i32) {
    %c0_i32 = arith.constant 0 : i32
    %c0_i32_0 = arith.constant 0 : i32
    return %arg0, %c0_i32 : i32, i32
  }
  func.func @transform_5(%arg0: i32) -> (i32, i32) {
    %c0_i32 = arith.constant 0 : i32
    %c0_i32_0 = arith.constant 0 : i32
    return %arg0, %c0_i32 : i32, i32
  }
}

</mosaic_0001>

<bundles_post_ra>
// kernel: tpu_custom_call.1
= control target key start
LH: loop header
LB: loop body
LE: loop exit
PB: predicated region body
PF: predicated region fallthrough
CT: control target
= control target key end

     0   :  { %s794_s18 = smov 0   ;;  %s958_s0 = inlined_call_operand.vmem [shape: f32[256,32], index: 0, kind: input, shape index: {}]   ;;  %s959_s1 = inlined_call_operand.vmem [shape: f32[256,32], index: 1, kind: input, shape index: {}]   ;;  %s960_s2 = inlined_call_operand.vmem [shape: f32[32,64], index: 2, kind: input, shape index: {}]   ;;  %s961_s3 = inlined_call_operand.vmem [shape: f32[1,64], index: 3, kind: input, shape index: {}]   ;;  %s962_s4 = inlined_call_operand.vmem [shape: f32[256,32], index: 4, kind: output, shape index: {0}]   ;;  %s963_s5 = inlined_call_operand.vmem [shape: f32[256,64], index: 5, kind: output, shape index: {1}]  }
   0x1 LB: > { %s652_s19 = sadd.s32 4294967295, %s762_s18   ;;  %p656_p0 = scmp.ge.s32.totalorder %s762_s18, 1  ;;  %s762_s18 = sphi %s794_s18, %s16_s18  }
   0x2   : > { %p202_p1 = scmp.lt.s32.totalorder %s762_s18, 3 }
   0x4   : > { %p203_p2 = pnand %p656_p0, %p202_p1 }
   0x5   : > { %v329_v0 = vld [vmem:[%s960_s2] sm:$0xff] (!%p203_p2)  ;;  %v330_v1 = vld [vmem:[%s960_s2 + $0x8] sm:$0xff] (!%p203_p2)  ;;  %v331_v2 = vld [vmem:[%s960_s2 + $0x10] sm:$0xff] (!%p203_p2)  ;;  %s657_s26 = sshll.u32 (!%p203_p2), %s652_s19, 4  ;;  %vm312_vm0 = vcmask (!%p203_p2), 261120   ;;  %vm533_vm1 = vcmask (!%p203_p2), 523264  }
   0x6   : > { %206 = sbr.rel (%p203_p2) target bundleno = 251 (0xfb), region = 36  ;;  %v736_v3 = vpack.c.bf16 (!%p203_p2), %v330_v1, %v329_v0  ;;  %v332_v4 = vld [vmem:[%s960_s2 + $0x18] sm:$0xff] (!%p203_p2)  ;;  %p241_p3 = scmp.lt.s32.totalorder (!%p203_p2), %s657_s26, 31  ;;  %v665_v54 = vld [vmem:[%s961_s3] ss:$0 sm:$0xff] (!%p203_p2) }
   0x7   : > { %v740_v5 = vpack.c.bf16 (!%p203_p2), %v332_v4, %v331_v2 }
   0x8   : > { %737 = vmatprep.subr.bf16.mxu0 (!%p203_p2), %v736_v3  ;;  %744 = vmatprep.subr.bf16.mxu1 (!%p203_p2), %v736_v3 }
   0x9   : > { %739 = vmatpush3.bf16.msra.mxu0 (!%p203_p2), %v736_v3  ;;  %746 = vmatpush3.bf16.msra.mxu1 (!%p203_p2), %v736_v3 }
   0xa   : > { %741 = vmatprep.subr.bf16.mxu0 (!%p203_p2), %v740_v5  ;;  %745 = vmatprep.subr.bf16.mxu1 (!%p203_p2), %v740_v5 }
   0xd   : > { %s965_s26 = smov (!%p241_p3, %s657_s26), 31  ;;  %743 = vmatpush3.bf16.msra.mxu0 %v740_v5  ;;  %747 = vmatpush3.bf16.msra.mxu1 %v740_v5 }
   0xe   : > { %s814_s29 = sshll.u32 %s965_s26, 3 }
   0xf   : > { %s820_s7 = scalar_lea.vmem %s958_s0, %s814_s29  ;;  %s826_s10 = scalar_lea.vmem %s959_s1, %s814_s29 }
  0x10   : > { %s832_s13 = scalar_lea.vmem %s962_s4, %s814_s29  ;;  %v264_v6 = vld [vmem:[%s820_s7] sm:$0xff]  ;;  %v265_v11 = vld [vmem:[%s820_s7 + $0x8] sm:$0xff]  ;;  %v266_v17 = vld [vmem:[%s820_s7 + $0x10] sm:$0xff]  ;;  %s921_s19 = scalar_lea.vmem %s963_s5, %s814_s29 }
  0x11   : > { %v280_v7 = vld [vmem:[%s826_s10] sm:$0xff]  ;;  %v281_v12 = vld [vmem:[%s826_s10 + $0x8] sm:$0xff]  ;;  %v282_v19 = vld [vmem:[%s826_s10 + $0x10] sm:$0xff] }
  0x12   : > { %v272_v8 = vld [vmem:[%s820_s7 + $0x40] sm:$0xff]  ;;  %v296_v9 = vsub.f32 %v264_v6, %v280_v7  ;;  %v297_v14 = vsub.f32 %v265_v11, %v281_v12  ;;  %v273_v15 = vld [vmem:[%s820_s7 + $0x48] sm:$0xff]  ;;  %v274_v20 = vld [vmem:[%s820_s7 + $0x50] sm:$0xff]  ;;  %v298_v22 = vsub.f32 %v266_v17, %v282_v19 }
  0x13   : > { %v288_v10 = vld [vmem:[%s826_s10 + $0x40] sm:$0xff]  ;;  %v289_v16 = vld [vmem:[%s826_s10 + $0x48] sm:$0xff]  ;;  %v290_v21 = vld [vmem:[%s826_s10 + $0x50] sm:$0xff] }
  0x14   : > { %v304_v13 = vsub.f32 %v272_v8, %v288_v10  ;;  %313 = vst.msk [vmem:[%s832_s13] sm:$0xff] %vm312_vm0, %v296_v9  ;;  %712 = vmatprep.mubr.msk.f32.mxu0 %vm312_vm0, %v296_v9  ;;  %v305_v18 = vsub.f32 %v273_v15, %v289_v16  ;;  %314 = vst.msk [vmem:[%s832_s13 + $0x8] sm:$0xff] %vm312_vm0, %v297_v14  ;;  %v306_v23 = vsub.f32 %v274_v20, %v290_v21  ;;  %v267_v24 = vld [vmem:[%s820_s7 + $0x18] sm:$0xff]  ;;  %v268_v29 = vld [vmem:[%s820_s7 + $0x20] sm:$0xff] }
  0x15   : > { %713 = vmatmul.mubr.msk.f32.vlgmr.msra.gmra.mrb[0].mxu0 %vm312_vm0, %v297_v14  ;;  %v283_v25 = vld [vmem:[%s826_s10 + $0x18] sm:$0xff]  ;;  %v284_v30 = vld [vmem:[%s826_s10 + $0x20] sm:$0xff]  ;;  %315 = vst.msk [vmem:[%s832_s13 + $0x10] sm:$0xff] %vm312_vm0, %v298_v22  ;;  %v269_v35 = vld [vmem:[%s820_s7 + $0x28] sm:$0xff] }
  0x16   : > { %321 = vst.msk [vmem:[%s832_s13 + $0x40] sm:$0xff] %vm312_vm0, %v304_v13  ;;  %724 = vmatprep.mubr.msk.f32.mxu1 %vm312_vm0, %v304_v13  ;;  %v275_v26 = vld [vmem:[%s820_s7 + $0x58] sm:$0xff]  ;;  %322 = vst.msk [vmem:[%s832_s13 + $0x48] sm:$0xff] %vm312_vm0, %v305_v18  ;;  %v299_v27 = vsub.f32 %v267_v24, %v283_v25  ;;  %715 = vmatprep.mubr.msk.f32.mxu0 %vm312_vm0, %v298_v22  ;;  %v300_v32 = vsub.f32 %v268_v29, %v284_v30  ;;  %v276_v33 = vld [vmem:[%s820_s7 + $0x60] sm:$0xff] }
  0x17   : > { %725 = vmatmul.mubr.msk.f32.vlgmr.msra.gmra.mrb[0].mxu1 %vm312_vm0, %v305_v18  ;;  %v291_v28 = vld [vmem:[%s826_s10 + $0x58] sm:$0xff]  ;;  %323 = vst.msk [vmem:[%s832_s13 + $0x50] sm:$0xff] %vm312_vm0, %v306_v23  ;;  %v292_v34 = vld [vmem:[%s826_s10 + $0x60] sm:$0xff]  ;;  %v285_v37 = vld [vmem:[%s826_s10 + $0x28] sm:$0xff] }
  0x18   : > { %727 = vmatprep.mubr.msk.f32.mxu1 %vm312_vm0, %v306_v23  ;;  %v307_v31 = vsub.f32 %v275_v26, %v291_v28  ;;  %316 = vst.msk [vmem:[%s832_s13 + $0x18] sm:$0xff] %vm312_vm0, %v299_v27  ;;  %v308_v36 = vsub.f32 %v276_v33, %v292_v34  ;;  %v277_v38 = vld [vmem:[%s820_s7 + $0x68] sm:$0xff]  ;;  %317 = vst.msk [vmem:[%s832_s13 + $0x20] sm:$0xff] %vm312_vm0, %v300_v32  ;;  %v301_v40 = vsub.f32 %v269_v35, %v285_v37  ;;  %v270_v42 = vld [vmem:[%s820_s7 + $0x30] sm:$0xff] }
  0x19   : > { %v293_v39 = vld [vmem:[%s826_s10 + $0x68] sm:$0xff]  ;;  %716 = vmatmul.mubr.msk.f32.gmra.mrb[2].mxu0 %vm312_vm0, %v299_v27  ;;  %v286_v43 = vld [vmem:[%s826_s10 + $0x30] sm:$0xff]  ;;  %v271_v47 = vld [vmem:[%s820_s7 + $0x38] sm:$0xff] }
  0x1a   : > { %324 = vst.msk [vmem:[%s832_s13 + $0x58] sm:$0xff] %vm312_vm0, %v307_v31  ;;  %v309_v41 = vsub.f32 %v277_v38, %v293_v39  ;;  %v278_v44 = vld [vmem:[%s820_s7 + $0x70] sm:$0xff]  ;;  %718 = vmatprep.mubr.msk.f32.mxu0 %vm312_vm0, %v300_v32  ;;  %325 = vst.msk [vmem:[%s832_s13 + $0x60] sm:$0xff] %vm312_vm0, %v308_v36  ;;  %v302_v45 = vsub.f32 %v270_v42, %v286_v43  ;;  %v287_v48 = vld [vmem:[%s826_s10 + $0x38] sm:$0xff] }
  0x1b   : > { %728 = vmatmul.mubr.msk.f32.gmra.mrb[2].mxu1 %vm312_vm0, %v307_v31  ;;  %v294_v46 = vld [vmem:[%s826_s10 + $0x70] sm:$0xff]  ;;  %318 = vst.msk [vmem:[%s832_s13 + $0x28] sm:$0xff] %vm312_vm0, %v301_v40  ;;  %v303_v50 = vsub.f32 %v271_v47, %v287_v48  ;;  %v279_v51 = vld [vmem:[%s820_s7 + $0x78] sm:$0xff] }
  0x1c   : > { %730 = vmatprep.mubr.msk.f32.mxu1 %vm312_vm0, %v308_v36  ;;  %326 = vst.msk [vmem:[%s832_s13 + $0x68] sm:$0xff] %vm312_vm0, %v309_v41  ;;  %v310_v49 = vsub.f32 %v278_v44, %v294_v46  ;;  %v295_v52 = vld [vmem:[%s826_s10 + $0x78] sm:$0xff]  ;;  %319 = vst.msk [vmem:[%s832_s13 + $0x30] sm:$0xff] %vm312_vm0, %v302_v45 }
  0x1d   : > { %v311_v53 = vsub.f32 %v279_v51, %v295_v52  ;;  %719 = vmatmul.mubr.msk.f32.gmra.mrb[4].mxu0 %vm312_vm0, %v301_v40  ;;  %320 = vst.msk [vmem:[%s832_s13 + $0x38] sm:$0xff] %vm312_vm0, %v303_v50 }
  0x1e   : > { %327 = vst.msk [vmem:[%s832_s13 + $0x70] sm:$0xff] %vm312_vm0, %v310_v49  ;;  %721 = vmatprep.mubr.msk.f32.mxu0 %vm312_vm0, %v302_v45 }
  0x1f   : > { %731 = vmatmul.mubr.msk.f32.gmra.mrb[4].mxu1 %vm312_vm0, %v309_v41  ;;  %328 = vst.msk [vmem:[%s832_s13 + $0x78] sm:$0xff] %vm312_vm0, %v311_v53 }
  0x20   : > { %733 = vmatprep.mubr.msk.f32.mxu1 %vm312_vm0, %v310_v49 }
  0x21   : > { %722 = vmatmul.mubr.msk.f32.gmra.mrb[6].mxu0 %vm312_vm0, %v303_v50 }
  0x23   : > { %734 = vmatmul.mubr.msk.f32.gmra.mrb[6].mxu1 %vm312_vm0, %v311_v53 }
  0xe8   : > { %v714_v55 = vpop.f32.mrb[0].mxu0 }
  0xe9   : > { %v460_v56 = vadd.f32 %v714_v55, %v665_v54  ;;  %v454_v58 = vpop.f32.mrb[1].mxu0 }
  0xea   : > { %v726_v57 = vpop.f32.mrb[0].mxu1  ;;  %v455_v60 = vadd.f32 %v665_v54, %v454_v58 }
  0xeb   : > { %v500_v59 = vadd.f32 %v726_v57, %v665_v54  ;;  %v494_v61 = vpop.f32.mrb[1].mxu1  ;;  %535 = vst.msk [vmem:[%s921_s19 + $0x8] sm:$0xff] %vm533_vm1, %v460_v56 }
  0xec   : > { %v495_v62 = vadd.f32 %v665_v54, %v494_v61  ;;  %534 = vst.msk [vmem:[%s921_s19] sm:$0xff] %vm533_vm1, %v455_v60  ;;  %v717_v63 = vpop.f32.mrb[2].mxu0 }
  0xed   : > { %543 = vst.msk [vmem:[%s921_s19 + $0x48] sm:$0xff] %vm533_vm1, %v500_v59  ;;  %v470_v0 = vadd.f32 %v717_v63, %v665_v54  ;;  %v464_v2 = vpop.f32.mrb[3].mxu0 }
  0xee   : > { %542 = vst.msk [vmem:[%s921_s19 + $0x40] sm:$0xff] %vm533_vm1, %v495_v62  ;;  %v729_v1 = vpop.f32.mrb[2].mxu1  ;;  %v465_v4 = vadd.f32 %v665_v54, %v464_v2 }
  0xef   : > { %v510_v3 = vadd.f32 %v729_v1, %v665_v54  ;;  %v504_v5 = vpop.f32.mrb[3].mxu1  ;;  %537 = vst.msk [vmem:[%s921_s19 + $0x18] sm:$0xff] %vm533_vm1, %v470_v0 }
  0xf0   : > { %v505_v6 = vadd.f32 %v665_v54, %v504_v5  ;;  %536 = vst.msk [vmem:[%s921_s19 + $0x10] sm:$0xff] %vm533_vm1, %v465_v4  ;;  %v720_v7 = vpop.f32.mrb[4].mxu0 }
  0xf1   : > { %545 = vst.msk [vmem:[%s921_s19 + $0x58] sm:$0xff] %vm533_vm1, %v510_v3  ;;  %v480_v8 = vadd.f32 %v720_v7, %v665_v54  ;;  %v474_v10 = vpop.f32.mrb[5].mxu0 }
  0xf2   : > { %544 = vst.msk [vmem:[%s921_s19 + $0x50] sm:$0xff] %vm533_vm1, %v505_v6  ;;  %v732_v9 = vpop.f32.mrb[4].mxu1  ;;  %v475_v12 = vadd.f32 %v665_v54, %v474_v10 }
  0xf3   : > { %v520_v11 = vadd.f32 %v732_v9, %v665_v54  ;;  %v514_v13 = vpop.f32.mrb[5].mxu1  ;;  %539 = vst.msk [vmem:[%s921_s19 + $0x28] sm:$0xff] %vm533_vm1, %v480_v8 }
  0xf4   : > { %v515_v14 = vadd.f32 %v665_v54, %v514_v13  ;;  %538 = vst.msk [vmem:[%s921_s19 + $0x20] sm:$0xff] %vm533_vm1, %v475_v12  ;;  %v723_v15 = vpop.f32.mrb[6].mxu0 }
  0xf5   : > { %547 = vst.msk [vmem:[%s921_s19 + $0x68] sm:$0xff] %vm533_vm1, %v520_v11  ;;  %v490_v16 = vadd.f32 %v723_v15, %v665_v54  ;;  %v484_v18 = vpop.f32.mrb[7].mxu0 }
  0xf6   : > { %546 = vst.msk [vmem:[%s921_s19 + $0x60] sm:$0xff] %vm533_vm1, %v515_v14  ;;  %v735_v17 = vpop.f32.mrb[6].mxu1  ;;  %v485_v20 = vadd.f32 %v665_v54, %v484_v18 }
  0xf7   : > { %v530_v19 = vadd.f32 %v735_v17, %v665_v54  ;;  %v524_v21 = vpop.f32.mrb[7].mxu1  ;;  %541 = vst.msk [vmem:[%s921_s19 + $0x38] sm:$0xff] %vm533_vm1, %v490_v16 }
  0xf8   : > { %v525_v22 = vadd.f32 %v665_v54, %v524_v21  ;;  %540 = vst.msk [vmem:[%s921_s19 + $0x30] sm:$0xff] %vm533_vm1, %v485_v20 }
  0xf9   : > { %549 = vst.msk [vmem:[%s921_s19 + $0x78] sm:$0xff] %vm533_vm1, %v530_v19 }
  0xfa   : > { %548 = vst.msk [vmem:[%s921_s19 + $0x70] sm:$0xff] %vm533_vm1, %v525_v22 }
  0xfb PF: > { %s16_s18 = sadd.s32 1, %s762_s18  }
  0xfc   : > { %p13_p4 = scmp.ge.s32.totalorder %s16_s18, 4  }
  0xfe   :  { %15 = sbr.rel (!%p13_p4) target bundleno = 1 (0x1), region = 81 }

</bundles_post_ra>
